<compile_context>
chip_gen: v7x
topology: tpu7x:2x2x1
jax: 0.10.0
libtpu: 0.0.40
codegen_flags: <defaults>
</compile_context>

<pallas_src>
import jax
import jax.numpy as jnp
from jax.experimental import pallas as pl
from jax.experimental.pallas import tpu as pltpu

LANES = 128
SUBLANES = 8
_VREG_ELEMS = LANES * SUBLANES                 # 1024 elements
_BLOCK_BYTES_PER_OPERAND = 4 * 1024 * 1024     # ~4 MiB per input/output slab
_VMEM_LIMIT_BYTES = 48 * 1024 * 1024           # safe on v5e/v6e/v7x physical VMEM


def _round_up(x, m):
    return -(-x // m) * m


def _make_add_snn_kernel(offset, t_max):
    """Kernel with the affine offset and clamp value folded in as Python-float
    compile-time constants (literals only; nothing captured as a jax Array)."""
    offset = float(offset)
    t_max = float(t_max)

    def kernel(tj1_ref, tj2_ref, out_ref):
        a = tj1_ref[...].astype(jnp.float32)
        b = tj2_ref[...].astype(jnp.float32)
        ti = a + b + offset
        # Keep torch.where semantics (NaN -> t_max); clamp value built from a
        # scalar literal broadcast so no constants are captured.
        clamp = jnp.full_like(ti, t_max)
        out_ref[...] = jnp.where(ti < t_max, ti, clamp).astype(out_ref.dtype)

    return kernel


class AddSNNLayer:
    """JAX/Pallas port of the PyTorch AddSNNLayer."""

    def __init__(self):
        self.noise = 0
        self.B_n = 1
        self.t_min = None
        self.t_max = None

    def set_params(self, t_min_prev, t_min, minimal_t_max=0):
        max_input = t_min - t_min_prev
        max_V = max_input * 2
        self.t_min = float(t_min)
        self.t_max = float(max(t_min + self.B_n * max_V, minimal_t_max))
        return (self.t_min, self.t_max)

    def __call__(self, tj1, tj2):
        assert tj1.shape == tj2.shape
        assert self.t_min is not None and self.t_max is not None
        orig_shape = tj1.shape

        # Stream in the native dtype (no wrapper-side HBM cast pass).
        out_dtype = jnp.promote_types(tj1.dtype, tj2.dtype)
        if tj1.dtype != out_dtype:
            tj1 = tj1.astype(out_dtype)
        if tj2.dtype != out_dtype:
            tj2 = tj2.astype(out_dtype)

        # Fold the affine constant once (in Python float64 for accuracy).
        offset = self.t_max - 2.0 * self.t_min
        t_max = self.t_max

        total = tj1.size
        f1 = tj1.reshape(-1)
        f2 = tj2.reshape(-1)

        aligned = (total // _VREG_ELEMS) * _VREG_ELEMS
        tail = total - aligned

        pieces = []
        if aligned:
            nrows = aligned // LANES                       # multiple of 8
            itemsize = jnp.dtype(out_dtype).itemsize
            target_rows = max(SUBLANES,
                              _BLOCK_BYTES_PER_OPERAND // (LANES * itemsize))
            # >= 2 balanced blocks when possible so both v7x TCs stream HBM.
            half_rows = _round_up(pl.cdiv(nrows, 2), SUBLANES)
            tile_rows = max(SUBLANES, min(nrows, target_rows, half_rows))
            grid = (pl.cdiv(nrows, tile_rows),)

            a2 = (f1 if tail == 0 else f1[:aligned]).reshape(nrows, LANES)
            b2 = (f2 if tail == 0 else f2[:aligned]).reshape(nrows, LANES)

            kernel = _make_add_snn_kernel(offset, t_max)
            out2 = pl.pallas_call(
                kernel,
                out_shape=jax.ShapeDtypeStruct((nrows, LANES), out_dtype),
                grid=grid,
                in_specs=[
                    pl.BlockSpec((tile_rows, LANES), lambda i: (i, 0)),
                    pl.BlockSpec((tile_rows, LANES), lambda i: (i, 0)),
                ],
                out_specs=pl.BlockSpec((tile_rows, LANES), lambda i: (i, 0)),
                compiler_params=pltpu.CompilerParams(
                    dimension_semantics=("parallel",),
                    vmem_limit_bytes=_VMEM_LIMIT_BYTES,
                ),
            )(a2, b2)
            pieces.append(out2.reshape(-1))

        if tail:
            # Tiny (<1024 elem) ragged remainder: plain jnp, no pad/slice
            # copies of the full tensor.
            ta = f1[aligned:].astype(jnp.float32)
            tb = f2[aligned:].astype(jnp.float32)
            ti = ta + tb + offset
            ti = jnp.where(ti < t_max, ti, jnp.full_like(ti, t_max))
            pieces.append(ti.astype(out_dtype))

        out = pieces[0] if len(pieces) == 1 else jnp.concatenate(pieces)
        return out.reshape(orig_shape)


def _reference(tj1, tj2, t_min, t_max):
    threshold = t_max - t_min
    ti = tj1 + tj2 - 2.0 * t_min + threshold + t_min
    return jnp.where(ti < t_max, ti, t_max)


if __name__ == "__main__":
    key = jax.random.PRNGKey(0)
    k1, k2 = jax.random.split(key)

    # Small NCHW inputs (spike-time tensors): batch=2, channels=4, 16x16 spatial.
    x1 = jax.random.uniform(k1, (2, 4, 16, 16), dtype=jnp.float32,
                            minval=0.0, maxval=1.0)
    x2 = jax.random.uniform(k2, (2, 4, 16, 16), dtype=jnp.float32,
                            minval=0.0, maxval=1.0)

    layer = AddSNNLayer()
    t_min, t_max = layer.set_params(t_min_prev=0.0, t_min=1.0, minimal_t_max=0)

    out = layer(x1, x2)
    out = jax.block_until_ready(out)

    ref = _reference(x1, x2, t_min, t_max)
    assert out.shape == x1.shape, (out.shape, x1.shape)
    assert out.dtype == x1.dtype, (out.dtype, x1.dtype)
    assert jnp.allclose(out, ref, atol=1e-6, rtol=1e-6), "mismatch vs reference"

    print("KERNEL_OK")
</pallas_src>

<mosaic_0001>
module attributes {stable_mosaic.version = 11 : i64} {
  func.func @kernel(%arg0: i32, %arg1: memref<8x128xf32, #tpu.memory_space<vmem>>, %arg2: memref<8x128xf32, #tpu.memory_space<vmem>>, %arg3: memref<8x128xf32, #tpu.memory_space<vmem>>) attributes {dimension_semantics = [#tpu.dimension_semantics<parallel>], iteration_bounds = array<i64: 2>, scalar_prefetch = 0 : i64, scratch_operands = 0 : i64, tpu.core_type = #tpu.core_type<tc>, window_params = [{transform_indices = @transform_0, window_bounds = array<i64: 8, 128>}, {transform_indices = @transform_1, window_bounds = array<i64: 8, 128>}, {transform_indices = @transform_2, window_bounds = array<i64: 8, 128>}]} {
    %c0 = arith.constant 0 : index
    %c0_0 = arith.constant 0 : index
    %0 = vector.load %arg1[%c0, %c0_0] : memref<8x128xf32, #tpu.memory_space<vmem>>, vector<8x128xf32>
    %c0_1 = arith.constant 0 : index
    %c0_2 = arith.constant 0 : index
    %1 = vector.load %arg2[%c0_1, %c0_2] : memref<8x128xf32, #tpu.memory_space<vmem>>, vector<8x128xf32>
    %2 = arith.addf %0, %1 : vector<8x128xf32>
    %cst = arith.constant 1.000000e+00 : f32
    %3 = vector.broadcast %cst : f32 to vector<8x128xf32>
    %4 = arith.addf %2, %3 : vector<8x128xf32>
    %cst_3 = arith.constant 3.000000e+00 : f32
    %5 = vector.broadcast %cst_3 : f32 to vector<8x128xf32>
    %cst_4 = arith.constant 3.000000e+00 : f32
    %6 = vector.broadcast %cst_4 : f32 to vector<8x128xf32>
    %7 = arith.cmpf olt, %4, %6 : vector<8x128xf32>
    %8 = arith.select %7, %4, %5 : vector<8x128xi1>, vector<8x128xf32>
    %c0_5 = arith.constant 0 : index
    %c0_6 = arith.constant 0 : index
    %9 = vector.load %arg3[%c0_5, %c0_6] : memref<8x128xf32, #tpu.memory_space<vmem>>, vector<8x128xf32>
    tpu.vector_store %arg3[%c0_5, %c0_6], %8 {strides = array<i32>} : memref<8x128xf32, #tpu.memory_space<vmem>>, vector<8x128xf32>,
    return
  }
  func.func @transform_0(%arg0: i32) -> (i32, i32) {
    %c0_i32 = arith.constant 0 : i32
    %c0_i32_0 = arith.constant 0 : i32
    return %arg0, %c0_i32 : i32, i32
  }
  func.func @transform_1(%arg0: i32) -> (i32, i32) {
    %c0_i32 = arith.constant 0 : i32
    %c0_i32_0 = arith.constant 0 : i32
    return %arg0, %c0_i32 : i32, i32
  }
  func.func @transform_2(%arg0: i32) -> (i32, i32) {
    %c0_i32 = arith.constant 0 : i32
    %c0_i32_0 = arith.constant 0 : i32
    return %arg0, %c0_i32 : i32, i32
  }
}

</mosaic_0001>

<bundles_post_ra>
// kernel: tpu_custom_call.1
= control target key start
LH: loop header
LB: loop body
LE: loop exit
PB: predicated region body
PF: predicated region fallthrough
CT: control target
= control target key end

     0   :  { %7 = vsyncpa [#allocation3], 0  ;;  %s735_s0 = inlined_call_operand.hbm [shape: f32[16,128], index: 0, kind: input, shape index: {}]   ;;  %s736_s1 = inlined_call_operand.hbm [shape: f32[16,128], index: 1, kind: input, shape index: {}]   ;;  %s737_s2 = inlined_call_operand.hbm [shape: f32[16,128], index: 2, kind: output, shape index: {}]  }
   0x1   :  { %9 = vsyncpa [#allocation3 + $0x1], 0 }
   0x2   :  { %10 = vsyncpa [#allocation6], 0 }
   0x3   :  { %12 = vsyncpa [#allocation6 + $0x1], 0 }
   0x4   :  { %13 = vsyncpa [#allocation4], 0 }
   0x5   :  { %15 = vsyncpa [#allocation4 + $0x1], 0  ;;  %s526_s9 = smov 0   ;;  %s528_s10 = smov 0  }
   0x6   :  { %s530_s11 = smov 0   ;;  %s532_s12 = smov 0  }
   0x7 LB: > { %s547_s13 = sadd.s32 4294967295, %s506_s12   ;;  %s310_s14 = sadd.s32 4294967294, %s506_s12   ;;  %s506_s12 = sphi %s532_s12, %s756_s12   ;;  %s502_s11 = sphi %s530_s11, %s755_s11   ;;  %s498_s10 = sphi %s528_s10, %s754_s10   ;;  %s494_s9 = sphi %s526_s9, %s753_s9  }
   0x8   : > { %s551_s15 = sadd.s32 1, %s506_s12   ;;  %s28_s16 = sadd.s32 1, %s502_s11 }
   0x9   : > { %s25_s17 = ssub.s32 %s506_s12, %s551_s15  ;;  %p35_p0 = scmp.ne.s32.totalorder %s502_s11, %s498_s10 }
   0xa   : > { %p26_p1 = scmp.eq.s32.totalorder %s25_s17, 0  ;;  %p36_p2 = scmp.eq.s32.totalorder %s506_s12, 0 }
   0xb   : > { %p41_p3 = scmp.ne.s32.totalorder %s498_s10, %s494_s9  ;;  %p42_p4 = scmp.eq.s32.totalorder %s547_s13, 0 }
   0xc   : > { %s563_s18 = scalar_select %p26_p1, %s502_s11, %s28_s16  }
   0xd   : > { %p565_p5 = por %p36_p2, %p35_p0  ;;  %p569_p6 = por %p42_p4, %p41_p3 }
   0xe   : > { %p91_p7 = scmp.eq.s32.totalorder %s547_s13, 1  ;;  %p97_p8 = scmp.eq.s32.totalorder %s310_s14, 1 }
   0xf   : > { %s741_s20 = scalar_select %p569_p6, 1, 0 }
  0x10   : > { %p342_p10 = scmp.lt.s32.totalorder %s506_s12, 2  ;;  %p576_p11 = por %p91_p7, %p35_p0 }
  0x11   : > { %p580_p12 = por %p97_p8, %p41_p3  ;;  %s585_s23 = sand.u32 1, %s502_s11  }
  0x12   : > { %s742_s21 = scalar_select %p576_p11, 1, 0 }
  0x13   : > { %s743_s22 = scalar_select %p580_p12, 1, 0 }
  0x14   : > { %s314_s24 = sshll.u32 %s506_s12, 7  ;;  %s313_s25 = sshll.u32 %s585_s23, 3 }
  0x15   : > { %s594_s28 = scalar_lea.hbm %s735_s0, %s314_s24  ;;  %s121_s29 = scalar_lea.vmem [#allocation2], %s313_s25 }
  0x16   : > { %s128_s30 = sshll.u32 %s121_s29, 4  ;;  %p600_p13 = pnand %p342_p10, %p565_p5  ;;  %s604_s30 = int_to_ptr.vmem [resolvable:$true] %s128_s30 }
  0x17   : > { %s118_s4 = scalar_lea.sflag [#allocation3], %s585_s23  ;;  %s376_s5 = scalar_lea.hbm %s594_s28, 128 }
  0x18   : > { %p377_p2 = scmp.ne.s32.totalorder %s594_s28, %s376_s5  ;;  %p378_p3 = pneg %p600_p13 }
  0x19   : > { %s381_s8 = scalar_lea.hbm %s735_s0, 256  ;;  %p382_p5 = scmp.lt.u32.totalorder %s594_s28, %s735_s0 }
  0x1a   : > { %p379_p4 = pnand %p378_p3, %p377_p2  ;;  %p383_p8 = scmp.lt.u32.totalorder %s381_s8, %s376_s5 }
  0x1b   : > { %p385_p9 = scmp.lt.u32.totalorder %s376_s5, %s594_s28 }
  0x1c   : > { %p380_p7 = pneg %p379_p4  ;;  %p384_p10 = por %p383_p8, %p382_p5 }
  0x1e   : > { %p386_p0 = por %p385_p9, %p384_p10 }
  0x20   : > { %p387_p1 = pnand %p386_p0, %p380_p7 }
  0x22   : > { %390 = shalt.err (!%p387_p1)
}
  0x23   : > { %s391_s17 = scalar_lea.vmem %s604_s30, 128  ;;  %s508_s19 = smov [#allocation2]  }
  0x24   : > { %p392_p2 = scmp.ne.s32.totalorder %s604_s30, %s391_s17  ;;  %s396_s26 = sshll.u32 %s508_s19, 4  ;;  %s397_s26 = int_to_ptr.vmem [resolvable:$false] %s396_s26 }
  0x25   : > { %s398_s27 = scalar_lea.vmem %s397_s26, 256  ;;  %p399_p11 = scmp.lt.s32.totalorder %s604_s30, %s397_s26 }
  0x26   : > { %p394_p4 = pnand %p392_p2, %p378_p3  ;;  %p400_p5 = scmp.lt.s32.totalorder %s398_s27, %s391_s17 }
  0x28   : > { %p395_p12 = pneg %p394_p4  ;;  %p401_p8 = por %p400_p5, %p399_p11 }
  0x2a   : > { %p402_p9 = pnand %p401_p8, %p395_p12 }
  0x2c   : > { %405 = shalt.err (!%p402_p9)
}
  0x2d   : > { %334 = dma.hbm_to_vmem [thread:$0]  (!%p600_p13), %s594_s28, 128, %s604_s30, %s118_s4  }
  0x2e   : > { %p745_p0 = scmp.lt.s32.totalorder %s506_s12, 3  ;;  %p746_p1 = scmp.ge.s32.totalorder %s506_s12, 1 }
  0x2f   : > { %s647_s7 = scalar_lea.hbm %s736_s1, %s314_s24  ;;  %s139_s8 = scalar_lea.vmem [#allocation5], %s313_s25 }
  0x30   : > { %p638_p7 = pnand %p746_p1, %p745_p0  ;;  %s146_s14 = sshll.u32 %s139_s8, 4  ;;  %s147_s14 = int_to_ptr.vmem [resolvable:$true] %s146_s14 }
  0x31   : > { %s136_s28 = scalar_lea.sflag [#allocation6], %s585_s23  ;;  %s406_s30 = scalar_lea.hbm %s647_s7, 128 }
  0x32   : > { %s747_s29 = scalar_select %p638_p7, 1, 0 }
  0x33   : > { %p407_p11 = scmp.ne.s32.totalorder %s647_s7, %s406_s30  ;;  %s411_s24 = scalar_lea.hbm %s736_s1, 256 }
  0x34   : > { %p412_p2 = scmp.lt.u32.totalorder %s647_s7, %s736_s1  ;;  %p413_p4 = scmp.lt.u32.totalorder %s411_s24, %s406_s30 }
  0x35   : > { %p409_p12 = pnand %p407_p11, %p378_p3  ;;  %p415_p8 = scmp.lt.u32.totalorder %s406_s30, %s647_s7 }
  0x36   : > { %p414_p5 = por %p413_p4, %p412_p2 }
  0x37   : > { %p410_p10 = pneg %p409_p12 }
  0x38   : > { %p416_p9 = por %p415_p8, %p414_p5 }
  0x3a   : > { %p417_p0 = pnand %p416_p9, %p410_p10 }
  0x3c   : > { %420 = shalt.err (!%p417_p0)
}
  0x3d   : > { %s421_s23 = scalar_lea.vmem %s147_s14, 128  ;;  %s509_s25 = smov [#allocation5]  }
  0x3e   : > { %p422_p1 = scmp.ne.s32.totalorder %s147_s14, %s421_s23  ;;  %s426_s26 = sshll.u32 %s509_s25, 4  ;;  %s427_s26 = int_to_ptr.vmem [resolvable:$false] %s426_s26 }
  0x3f   : > { %s428_s27 = scalar_lea.vmem %s427_s26, 256  ;;  %p429_p6 = scmp.lt.s32.totalorder %s147_s14, %s427_s26 }
  0x40   : > { %p424_p11 = pnand %p422_p1, %p378_p3  ;;  %p430_p7 = scmp.lt.s32.totalorder %s428_s27, %s421_s23 }
  0x42   : > { %p425_p12 = pneg %p424_p11  ;;  %p431_p2 = por %p430_p7, %p429_p6 }
  0x44   : > { %p432_p4 = pnand %p431_p2, %p425_p12 }
  0x46   : > { %435 = shalt.err (!%p432_p4)
}
  0x47   : > { %337 = dma.hbm_to_vmem [thread:$0]  (!%p600_p13), %s647_s7, 128, %s147_s14, %s136_s28  }
  0x48   : > { %p748_p10 = scmp.ne.s32.totalorder %s747_s29, 0 }
  0x49   : > { %s674_s5 = sand.u32 (!%p748_p10), 1, %s498_s10   ;;  %p749_p3 = scmp.ne.s32.totalorder (!%p748_p10), %s741_s20, 0 }
  0x4a   : > { %155 = sbr.rel (%p748_p10) target bundleno = 110 (0x6e), region = 28  ;;  %s318_s6 = sshll.u32 (!%p748_p10), %s674_s5, 3 }
  0x4b   : > { %s158_s8 = scalar_lea.sflag (!%p748_p10), [#allocation3], %s674_s5  ;;  %s161_s30 = scalar_lea.vmem (!%p748_p10), [#allocation2], %s318_s6 }
  0x51   : > { %481 = dma.done.wait (%p749_p3), %s158_s8, 128  }
  0x52   : > { %483 = vsyncadd (%p749_p3), %s158_s8, 4294967168  ;;  %s167_s3 = scalar_lea.sflag [#allocation6], %s674_s5  ;;  %s170_s7 = scalar_lea.vmem [#allocation5], %s318_s6 }
  0x53   : > { %485 = dma.done.wait (%p749_p3), %s167_s3, 128  }
  0x54   : > { %487 = vsyncadd (%p749_p3), %s167_s3, 4294967168  ;;  %v196_v0 = vld [vmem:[%s161_s30] sm:$0xff]  ;;  %v197_v1 = vld [vmem:[%s170_s7] sm:$0xff]  ;;  %s195_s29 = scalar_lea.vmem [#allocation7], %s318_s6  ;;  %s322_s28 = sshll.u32 %s547_s13, 7 }
  0x55   : > { %v198_v2 = vadd.f32 %v197_v1, %v196_v0  ;;  %s217_s14 = sshll.u32 %s195_s29, 4  ;;  %s693_s20 = scalar_lea.hbm %s737_s2, %s322_s28  ;;  %s688_s14 = int_to_ptr.vmem [resolvable:$true] %s217_s14 }
  0x56   : > { %s204_s24 = scalar_lea.sflag [#allocation4], %s674_s5  ;;  %s436_s17 = scalar_lea.vmem %s688_s14, 128 }
  0x57   : > { %v199_v3 = vadd.f32 1.0, %v198_v2  ;;  %p437_p6 = scmp.ne.s32.totalorder %s688_s14, %s436_s17  ;;  %p750_p13 = scmp.ne.s32.totalorder %s742_s21, 0 }
  0x58   : > { %s510_s13 = smov [#allocation7]  }
  0x59   : > { %vm200_vm0 = vcmp.lt.f32.partialorder %v199_v3, 3.0  ;;  %p438_p7 = pnand %p437_p6, %p750_p13  ;;  %s440_s19 = sshll.u32 %s510_s13, 4  ;;  %s441_s19 = int_to_ptr.vmem [resolvable:$false] %s440_s19 }
  0x5a   : > { %v201_v4 = vsel %vm200_vm0, %v199_v3, 3.0  ;;  %s442_s23 = scalar_lea.vmem %s441_s19, 256  ;;  %p443_p8 = scmp.lt.s32.totalorder %s688_s14, %s441_s19 }
  0x5b   : > { %202 = vst [vmem:[%s195_s29] sm:$0xff] %v201_v4  ;;  %p439_p5 = pneg %p438_p7  ;;  %p444_p9 = scmp.lt.s32.totalorder %s442_s23, %s436_s17 }
  0x5d   : > { %p445_p0 = por %p444_p9, %p443_p8 }
  0x5f   : > { %p446_p1 = pnand %p445_p0, %p439_p5 }
  0x61   : > { %449 = shalt.err (!%p446_p1)
}
  0x62   : > { %s450_s25 = scalar_lea.hbm %s693_s20, 128  ;;  %s454_s5 = scalar_lea.hbm %s737_s2, 256 }
  0x63   : > { %p451_p11 = scmp.ne.s32.totalorder %s693_s20, %s450_s25  ;;  %p455_p4 = scmp.lt.u32.totalorder %s693_s20, %s737_s2 }
  0x64   : > { %p456_p10 = scmp.lt.u32.totalorder %s454_s5, %s450_s25  ;;  %p458_p6 = scmp.lt.u32.totalorder %s450_s25, %s693_s20 }
  0x65   : > { %p452_p12 = pnand %p451_p11, %p750_p13 }
  0x66   : > { %p457_p3 = por %p456_p10, %p455_p4 }
  0x67   : > { %p453_p2 = pneg %p452_p12 }
  0x68   : > { %p459_p7 = por %p458_p6, %p457_p3 }
  0x6a   : > { %p460_p5 = pnand %p459_p7, %p453_p2 }
  0x6c   : > { %463 = shalt.err (!%p460_p5)
}
  0x6d   : > { %329 = dma.vmem_to_hbm [thread:$0]  (%p750_p13), %s688_s14, 128, %s693_s20, %s204_s24  }
  0x6e PF: > { %s229_s30 = sand.u32 1, %s494_s9   ;;  %p751_p8 = scmp.ne.s32.totalorder %s743_s22, 0 }
  0x6f   : > { %p752_p9 = scmp.ge.s32.totalorder %s506_s12, 2  ;;  %s230_s3 = scalar_lea.sflag [#allocation4], %s229_s30 }
  0x71   : > { %p339_p0 = pnand %p752_p9, %p751_p8 }
  0x73   : > { %489 = dma.done.wait (!%p339_p0), %s230_s3, 128  }
  0x74   : > { %491 = vsyncadd (!%p339_p0), %s230_s3, 4294967168  ;;  %p18_p1 = scmp.ge.s32.totalorder %s551_s15, 4   ;;  %s753_s9 = smov %s498_s10 }
  0x75   : > { %s754_s10 = smov %s502_s11  ;;  %s755_s11 = smov %s563_s18 }
  0x76   : > { %s756_s12 = smov %s551_s15  ;;  %20 = sbr.rel (!%p18_p1) target bundleno = 7 (0x7), region = 86 }
  0x7d   :  { %235 = vsyncpa [#allocation3], 1 }
  0x7e   :  { %237 = vsyncpa [#allocation3 + $0x1], 1 }
  0x7f   :  { %238 = vsyncpa [#allocation6], 1 }
  0x80   :  { %240 = vsyncpa [#allocation6 + $0x1], 1 }
  0x81   :  { %241 = vsyncpa [#allocation4], 1 }
  0x82   :  { %243 = vsyncpa [#allocation4 + $0x1], 1 }

</bundles_post_ra>
